<compile_context>
chip_gen: v6e
topology: v6e:2x2x1
jax: 0.10.0
libtpu: 0.0.40
codegen_flags: <defaults>
</compile_context>

<pallas_src>
import functools

import jax
import jax.numpy as jnp
from jax.experimental import pallas as pl
from jax.experimental.pallas import tpu as pltpu

_LANE = 128
_SUBLANE = 8


def _ce_kernel(logits_ref, targets_ref, loss_ref, loss_acc,
               *, num_classes, hw, lane_tile, steps_per_chunk):
    """One grid step processes a (C, T) tile of one (batch, spatial-chunk).

    logits_ref : (1, C, T)    native dtype, cast to f32 in-kernel
    targets_ref: (1, 1, T)    int32
    loss_ref   : (1, 1, 1, 1) f32   per-(batch, chunk) loss sum (last step)
    loss_acc   : (1, T)       f32   lane-dense VMEM accumulator
    """
    c = pl.program_id(1)          # spatial chunk (parallel)
    j = pl.program_id(2)          # step within chunk (accumulator axis)

    @pl.when(j == 0)
    def _():
        loss_acc[...] = jnp.zeros_like(loss_acc)

    x = logits_ref[0].astype(jnp.float32)        # (C, T)
    t = targets_ref[0]                           # (1, T) int32

    # Numerically-stable log-sum-exp over the class (sublane) axis.
    m = jnp.max(x, axis=0, keepdims=True)                                # (1, T)
    lse = m + jnp.log(jnp.sum(jnp.exp(x - m), axis=0, keepdims=True))    # (1, T)

    # Target-class logit via one-hot select along sublanes.
    class_iota = jax.lax.broadcasted_iota(jnp.int32, x.shape, 0)         # (C, T)
    tgt_logit = jnp.sum(jnp.where(class_iota == t, x, 0.0),
                        axis=0, keepdims=True)                           # (1, T)

    # Valid = in-bounds spatial position AND target in [0, C).  Covers
    # torch's ignore_index=-100 and masks the ragged tail of a clipped last
    # block, so garbage lanes (even NaN/Inf) never contribute.
    lane = jax.lax.broadcasted_iota(jnp.int32, t.shape, 1)               # (1, T)
    pos = (c * steps_per_chunk + j) * lane_tile + lane
    valid = (t >= 0) & (t < num_classes) & (pos < hw)

    loss_acc[...] += jnp.where(valid, lse - tgt_logit, 0.0)

    @pl.when(j == pl.num_programs(2) - 1)
    def _():
        loss_ref[...] = jnp.sum(loss_acc[...]).reshape(1, 1, 1, 1)


def cross_entropy_loss(logits_nchw, targets_nhw, *,
                       max_lane_tile=65536,
                       vmem_budget_bytes=40 * 1024 * 1024):
    """Mean cross-entropy over all (N, H, W) positions (ignore_index=-100).

    Matches torch.nn.CrossEntropyLoss() default (mean over non-ignored
    targets).  If every target is ignored the result is 0/0 -> NaN, same as
    torch.  Out-of-range labels (other than ignored ones) are silently
    treated as ignored instead of raising.
    """
    N, C, H, W = logits_nchw.shape
    HW = H * W

    # Free, contiguous reshapes -- no NCHW->NHWC transpose, no jnp.pad copy.
    x = logits_nchw.reshape(N, C, HW)
    t = targets_nhw.reshape(N, 1, HW).astype(jnp.int32)

    # Lane tile: full-extent when HW is small (no partial blocks at all),
    # otherwise a multiple of 128 as large as the VMEM budget allows so each
    # grid step moves >= ~1-2 MiB of logits (amortizes ~0.35 us step cost).
    max_lane_tile = max(_LANE, pl.cdiv(max_lane_tile, _LANE) * _LANE)
    T = min(HW, max_lane_tile)

    c_pad = pl.cdiv(C, _SUBLANE) * _SUBLANE
    lg_bytes = jnp.dtype(logits_nchw.dtype).itemsize

    def _vmem_bytes(tile):
        return (2 * c_pad * tile * lg_bytes        # logits, double-buffered
                + 2 * _SUBLANE * tile * 4          # int32 targets (8-sublane padded)
                + _SUBLANE * tile * 4)             # loss accumulator scratch

    while T > _LANE and _vmem_bytes(T) > vmem_budget_bytes:
        T = max(_LANE, (T // 2) // _LANE * _LANE)
    vmem_limit = min(max(int(_vmem_bytes(T) * 1.25) + (2 << 20), 16 << 20),
                     64 << 20)

    # Spatial chunking on a leading "parallel" axis so v7x megacore has work
    # even at N == 1.  Only chunk when it adds no (or negligible) re-read.
    nblocks = pl.cdiv(HW, T)
    if nblocks >= 2 and (nblocks % 2 == 0 or nblocks >= 9):
        nchunk = 2
    else:
        nchunk = 1
    steps = pl.cdiv(nblocks, nchunk)
    last_block = nblocks - 1

    def _in_map(n, c, j):
        # Clamp so a padded tail step (odd nblocks, nchunk=2) re-reads the
        # last real block; its contribution is zeroed in-kernel via pos < HW.
        return (n, 0, jnp.minimum(c * steps + j, last_block))

    kernel = functools.partial(_ce_kernel, num_classes=C, hw=HW,
                               lane_tile=T, steps_per_chunk=steps)

    loss_sums = pl.pallas_call(
        kernel,
        out_shape=jax.ShapeDtypeStruct((N, nchunk, 1, 1), jnp.float32),
        grid_spec=pltpu.PrefetchScalarGridSpec(
            num_scalar_prefetch=0,
            grid=(N, nchunk, steps),
            in_specs=[
                pl.BlockSpec((1, C, T), _in_map),
                pl.BlockSpec((1, 1, T), _in_map),
            ],
            out_specs=pl.BlockSpec((1, 1, 1, 1), lambda n, c, j: (n, c, 0, 0)),
            scratch_shapes=[pltpu.VMEM((1, T), jnp.float32)],
        ),
        compiler_params=pltpu.CompilerParams(
            dimension_semantics=("parallel", "parallel", "arbitrary"),
            vmem_limit_bytes=vmem_limit),
    )(x, t)

    # Valid-target count in the wrapper (N*HW int32 read, negligible vs the
    # logits traffic) instead of in-kernel VPU ops + a second padded scratch.
    tf = targets_nhw.reshape(-1).astype(jnp.int32)
    count = jnp.sum(((tf >= 0) & (tf < C)).astype(jnp.float32))
    return jnp.sum(loss_sums) / count


def _reference_cross_entropy(logits_nchw, targets_nhw, ignore_index=-100):
    """Pure-JAX reference matching torch.nn.CrossEntropyLoss (mean)."""
    N, C, H, W = logits_nchw.shape
    x = jnp.transpose(logits_nchw, (0, 2, 3, 1)).reshape(-1, C).astype(jnp.float32)
    t = targets_nhw.reshape(-1).astype(jnp.int32)
    logz = jax.scipy.special.logsumexp(x, axis=-1)
    tgt = jnp.take_along_axis(x, jnp.clip(t, 0, C - 1)[:, None], axis=-1)[:, 0]
    valid = t != ignore_index
    return jnp.sum(jnp.where(valid, logz - tgt, 0.0)) / jnp.sum(
        valid.astype(jnp.float32))


if __name__ == "__main__":
    key = jax.random.PRNGKey(0)

    # 1) Basic segmentation-style shape: N=2, C=4, 16x16 (single full tile).
    k1, k2 = jax.random.split(key)
    logits = jax.random.normal(k1, (2, 4, 16, 16), dtype=jnp.float32)
    targets = jax.random.randint(k2, (2, 16, 16), 0, 4, dtype=jnp.int32)
    out = jax.block_until_ready(cross_entropy_loss(logits, targets))
    ref = _reference_cross_entropy(logits, targets)
    assert jnp.allclose(out, ref, rtol=1e-5, atol=1e-5), (out, ref)

    # 2) Non-multiple-of-128 spatial size + ignore_index=-100 labels
    #    (full-extent lane tile, ignore handling).
    k3, k4 = jax.random.split(k1)
    logits2 = jax.random.normal(k3, (1, 5, 10, 11), dtype=jnp.float32)
    targets2 = jax.random.randint(k4, (1, 10, 11), 0, 5, dtype=jnp.int32)
    targets2 = targets2.at[0, :2, :3].set(-100)
    out2 = jax.block_until_ready(cross_entropy_loss(logits2, targets2))
    ref2 = _reference_cross_entropy(logits2, targets2)
    assert jnp.allclose(out2, ref2, rtol=1e-5, atol=1e-5), (out2, ref2)

    # 3) Multiple lane tiles with a ragged (clipped) last block, no padding:
    #    HW=300, T=128 -> 3 steps, in-kernel tail mask exercised.
    k5, k6 = jax.random.split(k3)
    logits3 = jax.random.normal(k5, (2, 3, 15, 20), dtype=jnp.float32)
    targets3 = jax.random.randint(k6, (2, 15, 20), 0, 3, dtype=jnp.int32)
    out3 = jax.block_until_ready(
        cross_entropy_loss(logits3, targets3, max_lane_tile=128))
    ref3 = _reference_cross_entropy(logits3, targets3)
    assert jnp.allclose(out3, ref3, rtol=1e-5, atol=1e-5), (out3, ref3)

    # 4) Spatial-chunk (megacore) path: HW=1024, T=256 -> 2 chunks x 2 steps.
    k7, k8 = jax.random.split(k5)
    logits4 = jax.random.normal(k7, (2, 3, 16, 64), dtype=jnp.float32)
    targets4 = jax.random.randint(k8, (2, 16, 64), 0, 3, dtype=jnp.int32)
    out4 = jax.block_until_ready(
        cross_entropy_loss(logits4, targets4, max_lane_tile=256))
    ref4 = _reference_cross_entropy(logits4, targets4)
    assert jnp.allclose(out4, ref4, rtol=1e-5, atol=1e-5), (out4, ref4)

    # TODO(synk): weighted variant (config.class_weights via np.load) not
    # reproduced since it requires an external .npy file; default unweighted
    # mean-reduction path (with ignore_index=-100) is implemented.
    print("KERNEL_OK")
</pallas_src>

<mosaic_0001>
module attributes {stable_mosaic.version = 11 : i64} {
  func.func @_ce_kernel(%arg0: i32, %arg1: i32, %arg2: i32, %arg3: memref<1x4x256xf32, #tpu.memory_space<vmem>>, %arg4: memref<1x1x256xi32, #tpu.memory_space<vmem>>, %arg5: memref<1x1x1x1xf32, #tpu.memory_space<vmem>>, %arg6: memref<1x256xf32, #tpu.memory_space<vmem>>) attributes {dimension_semantics = [#tpu.dimension_semantics<parallel>, #tpu.dimension_semantics<parallel>, #tpu.dimension_semantics<arbitrary>], iteration_bounds = array<i64: 2, 1, 1>, scalar_prefetch = 0 : i64, scratch_operands = 1 : i64, tpu.core_type = #tpu.core_type<tc>, window_params = [{transform_indices = @transform_0, window_bounds = array<i64: 1, 4, 256>}, {transform_indices = @transform_1, window_bounds = array<i64: 1, 1, 256>}, {transform_indices = @transform_2, window_bounds = array<i64: 1, 1, 1, 1>}]} {
    %c0_i32 = arith.constant 0 : i32
    %0 = arith.cmpi eq, %arg2, %c0_i32 : i32
    %1 = arith.extui %0 : i1 to i32
    %c0_i32_0 = arith.constant 0 : i32
    %2 = arith.cmpi ne, %1, %c0_i32_0 : i32
    scf.if %2 {
      %cst_18 = arith.constant 0.000000e+00 : f32
      %46 = vector.broadcast %cst_18 : f32 to vector<1x256xf32>
      %c0_19 = arith.constant 0 : index
      %c0_20 = arith.constant 0 : index
      %47 = vector.load %arg6[%c0_19, %c0_20] : memref<1x256xf32, #tpu.memory_space<vmem>>, vector<1x256xf32>
      tpu.vector_store %arg6[%c0_19, %c0_20], %46 {strides = array<i32>} : memref<1x256xf32, #tpu.memory_space<vmem>>, vector<1x256xf32>,
    } else {
    }
    %c0 = arith.constant 0 : index
    %c0_1 = arith.constant 0 : index
    %c0_2 = arith.constant 0 : index
    %3 = vector.load %arg3[%c0, %c0_1, %c0_2] : memref<1x4x256xf32, #tpu.memory_space<vmem>>, vector<1x4x256xf32>
    %4 = vector.shape_cast %3 : vector<1x4x256xf32> to vector<4x256xf32>
    %c0_3 = arith.constant 0 : index
    %c0_4 = arith.constant 0 : index
    %c0_5 = arith.constant 0 : index
    %5 = vector.load %arg4[%c0_3, %c0_4, %c0_5] : memref<1x1x256xi32, #tpu.memory_space<vmem>>, vector<1x1x256xi32>
    %6 = vector.shape_cast %5 : vector<1x1x256xi32> to vector<1x256xi32>
    %cst = arith.constant dense<0xFF800000> : vector<256xf32>
    %7 = vector.multi_reduction <maximumf>, %4, %cst [0] : vector<4x256xf32> to vector<256xf32>
    %8 = vector.shape_cast %7 : vector<256xf32> to vector<1x256xf32>
    %9 = vector.broadcast %8 : vector<1x256xf32> to vector<4x256xf32>
    %10 = arith.subf %4, %9 : vector<4x256xf32>
    %11 = math.exp %10 : vector<4x256xf32>
    %cst_6 = arith.constant dense<0.000000e+00> : vector<256xf32>
    %12 = vector.multi_reduction <add>, %11, %cst_6 [0] : vector<4x256xf32> to vector<256xf32>
    %13 = vector.shape_cast %12 : vector<256xf32> to vector<1x256xf32>
    %14 = math.log %13 : vector<1x256xf32>
    %15 = arith.addf %8, %14 : vector<1x256xf32>
    %16 = tpu.iota {dimensions = array<i32: 0>} : vector<4x256xi32>
    %17 = vector.broadcast %6 : vector<1x256xi32> to vector<4x256xi32>
    %18 = arith.cmpi eq, %16, %17 : vector<4x256xi32>
    %cst_7 = arith.constant 0.000000e+00 : f32
    %19 = vector.broadcast %cst_7 : f32 to vector<4x256xf32>
    %20 = arith.select %18, %4, %19 : vector<4x256xi1>, vector<4x256xf32>
    %cst_8 = arith.constant dense<0.000000e+00> : vector<256xf32>
    %21 = vector.multi_reduction <add>, %20, %cst_8 [0] : vector<4x256xf32> to vector<256xf32>
    %22 = vector.shape_cast %21 : vector<256xf32> to vector<1x256xf32>
    %23 = tpu.iota {dimensions = array<i32: 1>} : vector<1x256xi32>
    %c1_i32 = arith.constant 1 : i32
    %24 = arith.muli %arg1, %c1_i32 : i32
    %25 = arith.addi %24, %arg2 : i32
    %c256_i32 = arith.constant 256 : i32
    %26 = arith.muli %25, %c256_i32 : i32
    %27 = vector.broadcast %26 : i32 to vector<1x256xi32>
    %28 = arith.addi %27, %23 : vector<1x256xi32>
    %c0_i32_9 = arith.constant 0 : i32
    %29 = vector.broadcast %c0_i32_9 : i32 to vector<1x256xi32>
    %30 = arith.cmpi sge, %6, %29 : vector<1x256xi32>
    %c4_i32 = arith.constant 4 : i32
    %31 = vector.broadcast %c4_i32 : i32 to vector<1x256xi32>
    %32 = arith.cmpi slt, %6, %31 : vector<1x256xi32>
    %33 = arith.andi %30, %32 : vector<1x256xi1>
    %c256_i32_10 = arith.constant 256 : i32
    %34 = vector.broadcast %c256_i32_10 : i32 to vector<1x256xi32>
    %35 = arith.cmpi slt, %28, %34 : vector<1x256xi32>
    %36 = arith.andi %33, %35 : vector<1x256xi1>
    %c0_11 = arith.constant 0 : index
    %c0_12 = arith.constant 0 : index
    %37 = vector.load %arg6[%c0_11, %c0_12] : memref<1x256xf32, #tpu.memory_space<vmem>>, vector<1x256xf32>
    %38 = arith.subf %15, %22 : vector<1x256xf32>
    %cst_13 = arith.constant 0.000000e+00 : f32
    %39 = vector.broadcast %cst_13 : f32 to vector<1x256xf32>
    %40 = arith.select %36, %38, %39 : vector<1x256xi1>, vector<1x256xf32>
    %41 = arith.addf %37, %40 : vector<1x256xf32>
    %c0_14 = arith.constant 0 : index
    %c0_15 = arith.constant 0 : index
    %42 = vector.load %arg6[%c0_14, %c0_15] : memref<1x256xf32, #tpu.memory_space<vmem>>, vector<1x256xf32>
    tpu.vector_store %arg6[%c0_14, %c0_15], %41 {strides = array<i32>} : memref<1x256xf32, #tpu.memory_space<vmem>>, vector<1x256xf32>,
    %c0_i32_16 = arith.constant 0 : i32
    %43 = arith.cmpi eq, %arg2, %c0_i32_16 : i32
    %44 = arith.extui %43 : i1 to i32
    %c0_i32_17 = arith.constant 0 : i32
    %45 = arith.cmpi ne, %44, %c0_i32_17 : i32
    scf.if %45 {
      %c0_18 = arith.constant 0 : index
      %c0_19 = arith.constant 0 : index
      %46 = vector.load %arg6[%c0_18, %c0_19] : memref<1x256xf32, #tpu.memory_space<vmem>>, vector<1x256xf32>
      %47 = vector.shape_cast %46 : vector<1x256xf32> to vector<1x1x256xf32>
      %cst_20 = arith.constant dense<0.000000e+00> : vector<1xf32>
      %48 = vector.multi_reduction <add>, %47, %cst_20 [1, 2] : vector<1x1x256xf32> to vector<1xf32>
      %49 = vector.shape_cast %48 : vector<1xf32> to vector<1x1x1xf32>
      %50 = vector.extract %49[0, 0, 0] : f32 from vector<1x1x1xf32>
      %51 = vector.broadcast %50 : f32 to vector<1x1x1x1xf32>
      %c0_21 = arith.constant 0 : index
      %c0_22 = arith.constant 0 : index
      %c0_23 = arith.constant 0 : index
      %c0_24 = arith.constant 0 : index
      %52 = vector.load %arg5[%c0_21, %c0_22, %c0_23, %c0_24] : memref<1x1x1x1xf32, #tpu.memory_space<vmem>>, vector<1x1x1x1xf32>
      tpu.vector_store %arg5[%c0_21, %c0_22, %c0_23, %c0_24], %51 {strides = array<i32>} : memref<1x1x1x1xf32, #tpu.memory_space<vmem>>, vector<1x1x1x1xf32>,
    } else {
    }
    return
  }
  func.func @transform_0(%arg0: i32, %arg1: i32, %arg2: i32) -> (i32, i32, i32) {
    %c1_i32 = arith.constant 1 : i32
    %0 = arith.muli %arg1, %c1_i32 : i32
    %1 = arith.addi %0, %arg2 : i32
    %c0_i32 = arith.constant 0 : i32
    %2 = arith.minsi %1, %c0_i32 : i32
    %c0_i32_0 = arith.constant 0 : i32
    %c0_i32_1 = arith.constant 0 : i32
    return %arg0, %c0_i32_0, %2 : i32, i32, i32
  }
  func.func @transform_1(%arg0: i32, %arg1: i32, %arg2: i32) -> (i32, i32, i32) {
    %c1_i32 = arith.constant 1 : i32
    %0 = arith.muli %arg1, %c1_i32 : i32
    %1 = arith.addi %0, %arg2 : i32
    %c0_i32 = arith.constant 0 : i32
    %2 = arith.minsi %1, %c0_i32 : i32
    %c0_i32_0 = arith.constant 0 : i32
    %c0_i32_1 = arith.constant 0 : i32
    return %arg0, %c0_i32_0, %2 : i32, i32, i32
  }
  func.func @transform_2(%arg0: i32, %arg1: i32, %arg2: i32) -> (i32, i32, i32, i32) {
    %c0_i32 = arith.constant 0 : i32
    %c0_i32_0 = arith.constant 0 : i32
    %c0_i32_1 = arith.constant 0 : i32
    return %arg0, %arg1, %c0_i32, %c0_i32_0 : i32, i32, i32, i32
  }
}

</mosaic_0001>

<bundles_post_ra>
// kernel: tpu_custom_call.1
= control target key start
LH: loop header
LB: loop body
LE: loop exit
PB: predicated region body
PF: predicated region fallthrough
CT: control target
= control target key end

     0   :  { %7 = vsyncpa [#allocation4], 0  ;;  %s922_s0 = inlined_call_operand.hbm [shape: f32[2,4,256], index: 0, kind: input, shape index: {}]   ;;  %s923_s1 = inlined_call_operand.hbm [shape: s32[2,1,256], index: 1, kind: input, shape index: {}]   ;;  %s924_s2 = inlined_call_operand.vmem [shape: f32[2,1,1,1], index: 2, kind: output, shape index: {}]  }
   0x1   :  { %9 = vsyncpa [#allocation4 + $0x1], 0 }
   0x2   :  { %10 = vsyncpa [#allocation6], 0 }
   0x3   :  { %12 = vsyncpa [#allocation6 + $0x1], 0  ;;  %s765_s9 = smov 0   ;;  %s767_s10 = smov 0  }
   0x4   :  { %s769_s11 = smov 0   ;;  %s771_s12 = smov 0  }
   0x5   :  { %s773_s13 = smov 0   ;;  %s775_s14 = smov 0  }
   0x6 LB: > { %s544_s15 = sadd.s32 4294967295, %s743_s14   ;;  %s37_s16 = sadd.s32 1, %s739_s13  ;;  %s743_s14 = sphi %s775_s14, %s18_s14   ;;  %s739_s13 = sphi %s773_s13, %s935_s13   ;;  %s735_s12 = sphi %s771_s12, %s934_s12   ;;  %s731_s11 = sphi %s769_s11, %s933_s11   ;;  %s727_s10 = sphi %s767_s10, %s932_s10   ;;  %s723_s9 = sphi %s765_s9, %s931_s9  }
   0x7   : > { %p39_p0 = scmp.ge.s32.totalorder %s37_s16, 2  ;;  %s52_s17 = sadd.s32 1, %s731_s11 }
   0x8   : > { %p59_p1 = scmp.ne.s32.totalorder %s731_s11, %s727_s10  ;;  %p60_p2 = scmp.eq.s32.totalorder %s743_s14, 0 }
   0x9   : > { %s937_s16 = smov (%p39_p0, %s37_s16), 0  ;;  %p65_p4 = scmp.ne.s32.totalorder %s727_s10, %s723_s9 }
   0xa   : > { %p801_p3 = por %p60_p2, %p59_p1  ;;  %s47_s19 = ssub.s32 %s739_s13, %s937_s16 }
   0xb   : > { %p66_p5 = scmp.eq.s32.totalorder %s544_s15, 0  ;;  %p50_p6 = scmp.eq.s32.totalorder %s47_s19, 0 }
   0xc   : > { %p574_p8 = scmp.lt.s32.totalorder %s743_s14, 2  ;;  %s817_s22 = sand.u32 1, %s731_s11  }
   0xd   : > { %p808_p7 = por %p66_p5, %p65_p4  ;;  %s559_s23 = sshll.u32 %s739_s13, 7 }
   0xe   : > { %s814_s21 = scalar_select %p50_p6, %s731_s11, %s52_s17  }
   0xf   : > { %s548_s24 = sshll.u32 %s817_s22, 3  ;;  %s166_s27 = scalar_lea.hbm %s922_s0, %s559_s23 }
  0x10   : > { %s155_s28 = scalar_lea.vmem [#allocation3], %s548_s24  ;;  %p826_p9 = pnand %p574_p8, %p801_p3 }
  0x11   : > { %s168_s29 = sshll.u32 %s155_s28, 4  ;;  %p554_p10 = scmp.ge.s32.totalorder %s743_s14, 1  ;;  %s169_s29 = int_to_ptr.vmem [resolvable:$true] %s168_s29 }
  0x12   : > { %p197_p11 = scmp.lt.s32.totalorder %s743_s14, 3  ;;  %s152_s3 = scalar_lea.sflag [#allocation4], %s817_s22 }
  0x13   : > { %p635_p12 = pneg %p826_p9  ;;  %s646_s4 = scalar_lea.vmem %s169_s29, 128 }
  0x14   : > { %p647_p13 = scmp.ne.s32.totalorder %s169_s29, %s646_s4  ;;  %s745_s5 = smov [#allocation3]  }
  0x15   : > { %s651_s6 = sshll.u32 %s745_s5, 4  ;;  %s652_s6 = int_to_ptr.vmem [resolvable:$false] %s651_s6 }
  0x16   : > { %p649_p0 = pnand %p647_p13, %p635_p12  ;;  %s653_s7 = scalar_lea.vmem %s652_s6, 256 }
  0x17   : > { %p654_p2 = scmp.lt.s32.totalorder %s169_s29, %s652_s6  ;;  %p655_p3 = scmp.lt.s32.totalorder %s653_s7, %s646_s4 }
  0x18   : > { %p650_p1 = pneg %p649_p0 }
  0x19   : > { %p656_p4 = por %p655_p3, %p654_p2 }
  0x1b   : > { %p657_p5 = pnand %p656_p4, %p650_p1 }
  0x1d   : > { %660 = shalt.err (!%p657_p5)
}
  0x1e   : > { %570 = dma.hbm_to_vmem [thread:$0]  (!%p826_p9), %s166_s27, 128, %s169_s29, %s152_s3  }
  0x1f   : > { %p844_p6 = pnand %p554_p10, %p197_p11  ;;  %s551_s9 = sshll.u32 %s817_s22, 1 }
  0x20   : > { %s560_s15 = sshll.u32 %s739_s13, 5  ;;  %s179_s23 = scalar_lea.vmem [#allocation5], %s551_s9 }
  0x21   : > { %s190_s19 = scalar_lea.hbm %s923_s1, %s560_s15  ;;  %s192_s24 = sshll.u32 %s179_s23, 4  ;;  %s193_s24 = int_to_ptr.vmem [resolvable:$true] %s192_s24 }
  0x22   : > { %s176_s25 = scalar_lea.sflag [#allocation6], %s817_s22  ;;  %s674_s26 = scalar_lea.vmem %s193_s24, 32 }
  0x23   : > { %p675_p8 = scmp.ne.s32.totalorder %s193_s24, %s674_s26  ;;  %s746_s27 = smov [#allocation5]  }
  0x24   : > { %s679_s28 = sshll.u32 %s746_s27, 4  ;;  %s680_s28 = int_to_ptr.vmem [resolvable:$false] %s679_s28 }
  0x25   : > { %p677_p13 = pnand %p675_p8, %p635_p12  ;;  %s681_s29 = scalar_lea.vmem %s680_s28, 64 }
  0x26   : > { %p682_p10 = scmp.lt.s32.totalorder %s193_s24, %s680_s28  ;;  %p683_p11 = scmp.lt.s32.totalorder %s681_s29, %s674_s26 }
  0x27   : > { %p678_p0 = pneg %p677_p13 }
  0x28   : > { %p684_p1 = por %p683_p11, %p682_p10 }
  0x2a   : > { %p685_p2 = pnand %p684_p1, %p678_p0 }
  0x2c   : > { %688 = shalt.err (!%p685_p2)
}
  0x2d   : > { %573 = dma.hbm_to_vmem [thread:$0]  (!%p826_p9), %s190_s19, 32, %s193_s24, %s176_s25  }
  0x2e   : > { %201 = sbr.rel (%p844_p6) target bundleno = 350 (0x15e), region = 28  ;;  %s203_s22 = sand.u32 (!%p844_p6), 1, %s727_s10  }
  0x2f   : > { %s555_s3 = sshll.u32 (!%p844_p6), %s203_s22, 3  ;;  %s204_s4 = scalar_lea.sflag (!%p844_p6), [#allocation4], %s203_s22 }
  0x30   : > { %s207_s5 = scalar_lea.vmem (!%p844_p6), [#allocation3], %s555_s3 }
  0x33   : > { %714 = dma.done.wait (%p808_p7), %s204_s4, 128  }
  0x34   : > { %716 = vsyncadd (%p808_p7), %s204_s4, 4294967168  ;;  %s556_s6 = sshll.u32 %s203_s22, 1  ;;  %s213_s7 = scalar_lea.sflag [#allocation6], %s203_s22 }
  0x35   : > { %s216_s9 = scalar_lea.vmem [#allocation5], %s556_s6 }
  0x36   : > { %718 = dma.done.wait (%p808_p7), %s213_s7, 32  }
  0x37   : > { %720 = vsyncadd (%p808_p7), %s213_s7, 4294967264  ;;  %v261_v0 = vlaneseq  ;;  %v747_v2 = vmov 0.0   ;;  %vm271_vm1 = vcmask 1043456   ;;  %v266_v3 = vld [vmem:[%s207_s5] sm:$0xff]  ;;  %v267_v24 = vld [vmem:[%s216_s9] sm:$0x3] }
  0x38   : > { %v269_v4 = vcombine.high %v266_v3, %v266_v3  ;;  %v272_v5 = vsel %vm271_vm1, %v266_v3, -inf  ;;  %v748_v53 = vmov 1966171168   ;;  %v749_v60 = vmov 1   ;;  %p251_p7 = scmp.lt.s32.totalorder %s735_s12, 1 }
  0x39   : > { %vm870_vm0 = vcmp.lt.s32.totalorder %v261_v0, 256  ;;  %v273_v6 = vrot.slane %v272_v5, 4  ;;  %v878_v22 = vshrl.u32 %v261_v0, 7  ;;  %v361_v54 = vunpack.c.l.s4 %v748_v53 }
  0x3a   : > { %265 = vst.msk [vmem:[#allocation2] sm:$0x3] %vm870_vm0, %v747_v2  ;;  %v279_v7 = vsel %vm271_vm1, %v269_v4, -inf  ;;  %v359_v61 = vcombine.low %v749_v60, %v749_v60  ;;  %vm352_vm4 = vcmp.ge.s32.totalorder %v267_v24, 0  ;;  %vm353_vm5 = vcmp.lt.s32.totalorder %v267_v24, 4  ;;  %s939_s12 = smov (!%p251_p7, %s735_s12), 1 }
  0x3b   : > { %v274_v8 = vmax.f32 %v272_v5, %v273_v6  ;;  %v280_v9 = vrot.slane %v279_v7, 4  ;;  %v320_v23 = vsub.s32 0, %v878_v22  ;;  %v324_v25 = vsub.s32 1, %v878_v22  ;;  %vm354_vm6 = vmand %vm352_vm4, %vm353_vm5  ;;  %s256_s8 = scalar_lea.vmem %s924_s2, %s939_s12 }
  0x3c   : > { %v362_v57 = vunpack.c.0.s8 %v361_v54  ;;  %vm419_vm9 = vcmask 1040384   ;;  %vm433_vm10 = vcmask 0  }
  0x3d   : > { %v275_v10 = vrot.slane %v274_v8, 2  ;;  %v281_v11 = vmax.f32 %v279_v7, %v280_v9  ;;  %v321_v26 = vrot.slane %v267_v24, %v320_v23  ;;  %v325_v27 = vrot.slane %v267_v24, %v324_v25 }
  0x3e   : > { %v365_v62 = vsub.s32 %v362_v57, %v878_v22 }
  0x3f   : > { %v276_v12 = vmax.f32 %v274_v8, %v275_v10  ;;  %v282_v13 = vrot.slane %v281_v11, 2  ;;  %vm326_vm2 = vcmp.eq.s32.totalorder %v878_v22, %v321_v26  ;;  %vm327_vm3 = vcmp.eq.s32.totalorder %v878_v22, %v325_v27 }
  0x40   : > { %v328_v32 = vsel %vm326_vm2, %v266_v3, 0.0  ;;  %v329_v36 = vsel %vm327_vm3, %v269_v4, 0.0  ;;  %v366_v4 = vrot.slane %v359_v61, %v365_v62 }
  0x41   : > { %v277_v14 = vrot.slane %v276_v12, 1  ;;  %v283_v15 = vmax.f32 %v281_v11, %v282_v13  ;;  %v330_v37 = vsel %vm271_vm1, %v328_v32, 0.0  ;;  %v337_v40 = vsel %vm271_vm1, %v329_v36, 0.0 }
  0x42   : > { %v331_v43 = vrot.slane %v330_v37, 4  ;;  %v338_v46 = vrot.slane %v337_v40, 4  ;;  %v373_v10 = vrot.slane %v366_v4, %v365_v62 }
  0x43   : > { %v278_v16 = vmax.f32 %v276_v12, %v277_v14  ;;  %v284_v17 = vrot.slane %v283_v15, 1 }
  0x44   : > { %v332_v49 = vadd.f32 %v331_v43, %v330_v37  ;;  %v339_v51 = vadd.f32 %v338_v46, %v337_v40  ;;  %vm374_vm7 = vcmp.ne.s32.totalorder %v373_v10, 0 }
  0x45   : > { %v285_v18 = vmax.f32 %v283_v15, %v284_v17  ;;  %vm375_vm8 = vmand %vm354_vm6, %vm374_vm7  ;;  %v376_v15 = vld [vmem:[#allocation2] sm:$0x3] }
  0x46   : > { %v333_v52 = vrot.slane %v332_v49, 2  ;;  %v340_v55 = vrot.slane %v339_v51, 2 }
  0x47   : > { %v288_v19 = vcombine.low %v278_v16, %v285_v18 }
  0x48   : > { %v334_v56 = vadd.f32 %v333_v52, %v332_v49  ;;  %v341_v58 = vadd.f32 %v340_v55, %v339_v51 }
  0x49   : > { %v290_v20 = vsub.f32 %v266_v3, %v288_v19 }
  0x4a   : > { %v335_v59 = vrot.slane %v334_v56, 1  ;;  %v342_v63 = vrot.slane %v341_v58, 1 }
  0x4b   : > { %v291_v21 = vmul.f32 1.442695, %v290_v20 }
  0x4c   : > { %v336_v3 = vadd.f32 %v335_v59, %v334_v56  ;;  %v343_v8 = vadd.f32 %v342_v63, %v341_v58 }
  0x4d   : > { %627 = vpow2.f32 %v291_v21 }
  0x5a   : > { %v628_v28 = vpop.eup %627 }
  0x5b   : > { %v294_v29 = vcombine.high %v628_v28, %v628_v28  ;;  %v296_v30 = vsel %vm271_vm1, %v628_v28, 0.0 }
  0x5c   : > { %v297_v31 = vrot.slane %v296_v30, 4 }
  0x5d   : > { %v303_v33 = vsel %vm271_vm1, %v294_v29, 0.0 }
  0x5e   : > { %v298_v34 = vadd.f32 %v297_v31, %v296_v30  ;;  %v304_v35 = vrot.slane %v303_v33, 4 }
  0x60   : > { %v299_v38 = vrot.slane %v298_v34, 2  ;;  %v305_v39 = vadd.f32 %v304_v35, %v303_v33 }
  0x62   : > { %v300_v41 = vadd.f32 %v299_v38, %v298_v34  ;;  %v306_v42 = vrot.slane %v305_v39, 2 }
  0x64   : > { %v301_v44 = vrot.slane %v300_v41, 1  ;;  %v307_v45 = vadd.f32 %v306_v42, %v305_v39 }
  0x66   : > { %v302_v47 = vadd.f32 %v301_v44, %v300_v41  ;;  %v308_v48 = vrot.slane %v307_v45, 1 }
  0x68   : > { %v309_v50 = vadd.f32 %v308_v48, %v307_v45  ;;  %629 = vlog2.f32 %v302_v47 }
  0x6a   : > { %631 = vlog2.f32 %v309_v50 }
  0x75   : > { %v630_v0 = vpop.eup %629 }
  0x76   : > { %v311_v2 = vmul.f32 0.6931472, %v630_v0 }
  0x77   : > { %v632_v5 = vpop.eup %631 }
  0x78   : > { %v313_v6 = vmul.f32 0.6931472, %v632_v5  ;;  %v314_v7 = vadd.f32 %v311_v2, %v278_v16 }
  0x7a   : > { %v315_v9 = vadd.f32 %v313_v6, %v285_v18  ;;  %v377_v11 = vsub.f32 %v314_v7, %v336_v3 }
  0x7c   : > { %v378_v12 = vsub.f32 %v315_v9, %v343_v8 }
  0x7e   : > { %v381_v13 = vcombine.low %v377_v11, %v378_v12 }
  0x80   : > { %v388_v14 = vrot.slane %v381_v13, %v365_v62 }
  0x82   : > { %v395_v17 = vrot.slane %v388_v14, %v365_v62 }
  0x84   : > { %v397_v19 = vsel %vm375_vm8, %v395_v17, 0.0 }
  0x85   : > { %v398_v20 = vadd.f32 %v397_v19, %v376_v15 }
  0x87   : > { %403 = vst.msk [vmem:[#allocation2] sm:$0x3] %vm870_vm0, %v398_v20 }
  0x8e   : > { %v407_v16 = vld [vmem:[#allocation2] sm:$0x3] }
  0x8f   : > { %v412_v18 = vrot.slane %v407_v16, %v320_v23  ;;  %v416_v21 = vrot.slane %v407_v16, %v324_v25 }
  0x91   : > { %v420_v24 = vsel %vm419_vm9, %v412_v18, 0.0  ;;  %v421_v26 = vsel %vm419_vm9, %v416_v21, 0.0 }
  0x92   : > { %v422_v27 = vadd.f32 %v421_v26, %v420_v24 }
  0x94   : > { %423 = vadd.xlane.f32.xlu0 %v422_v27 }
 0x11d   : > { %v424_v28 = vpop.xlane.xlu0 %423 }
 0x11e   : > { %v425_v29 = vrot.slane %v424_v28, 4 }
 0x120   : > { %v426_v30 = vadd.f32 %v425_v29, %v424_v28 }
 0x122   : > { %v427_v31 = vrot.slane %v426_v30, 2 }
 0x124   : > { %v428_v1 = vadd.f32 %v427_v31, %v426_v30 }
 0x126   : > { %v429_v32 = vrot.slane %v428_v1, 1 }
 0x128   : > { %v430_v33 = vadd.f32 %v429_v32, %v428_v1 }
 0x12a   : > { %561 = vpush %v430_v33 }
 0x15b   : > { %s562_s15 = spop %561 }
 0x15c   : > { %v432_v22 = vstv %s562_s15 }
 0x15d   : > { %434 = vst.msk [vmem:[%s256_s8] sm:$0x1] %vm433_vm10, %v432_v22 }
 0x15e PF: > { %s18_s14 = sadd.s32 1, %s743_s14   ;;  %s931_s9 = smov %s727_s10 }
 0x15f   : > { %p15_p9 = scmp.ge.s32.totalorder %s18_s14, 4   ;;  %s932_s10 = smov %s731_s11 }
 0x160   : > { %s933_s11 = smov %s814_s21  ;;  %s934_s12 = smov %s739_s13 }
 0x161   : > { %s935_s13 = smov %s937_s16  ;;  %17 = sbr.rel (!%p15_p9) target bundleno = 6 (0x6), region = 89 }
 0x166   :  { %458 = vsyncpa [#allocation4], 1 }
 0x167   :  { %460 = vsyncpa [#allocation4 + $0x1], 1 }
 0x168   :  { %461 = vsyncpa [#allocation6], 1 }
 0x169   :  { %463 = vsyncpa [#allocation6 + $0x1], 1 }

</bundles_post_ra>
